<compile_context>
chip_gen: v7x
topology: tpu7x:2x2x1
jax: 0.10.0
libtpu: 0.0.40
codegen_flags: <defaults>
</compile_context>

<pallas_src>
import math

import jax
import jax.numpy as jnp
from jax import lax
from jax.experimental import pallas as pl
from jax.experimental.pallas import tpu as pltpu

# EATA hyper-parameters (module defaults), baked in as compile-time constants.
E_MARGIN = math.log(1000.0) / 2.0 - 1.0
D_MARGIN = 0.05
ALPHA0 = 0.5
EPS = 1e-8
NEG_BIG = -1e9     # finite large-negative bias for padded classes (not -inf)


def _round_up(v, m):
    return (v + m - 1) // m * m


def eata_kernel(nvalid_ref, flag_ref, x_ref, w_ref, b_ref, cur_ref,
                logits_ref, upd_ref, stats_ref, acc_ref):
    k = pl.program_id(0)

    # ---- init accumulator on first reduction step ----
    @pl.when(k == 0)
    def _():
        acc_ref[...] = jnp.zeros_like(acc_ref)

    # ---- streaming bf16 matmul on the MXU, f32 accumulation ----
    acc_ref[...] += jnp.dot(x_ref[...], w_ref[...],
                            preferred_element_type=jnp.float32)

    # ---- EATA epilogue on the last reduction step ----
    @pl.when(k == pl.num_programs(0) - 1)
    def _():
        logits = acc_ref[...] + b_ref[...]            # (B_pad, K_pad) f32
        logits_ref[...] = logits

        # softmax_entropy(outputs) per sample (f32). Padded classes carry a
        # -1e9 bias so p == 0 exactly and p*logp == 0 (no NaN).
        m = jnp.max(logits, axis=1, keepdims=True)
        z = logits - m
        lse = jnp.log(jnp.sum(jnp.exp(z), axis=1, keepdims=True))
        logp = z - lse                                # log_softmax
        p = jnp.exp(logp)                             # softmax
        ent = -jnp.sum(p * logp, axis=1, keepdims=True)   # (B_pad, 1)

        # mask out padded batch rows
        nvalid = nvalid_ref[0]
        row_ids = lax.broadcasted_iota(jnp.int32, ent.shape, 0)
        rowmask = (row_ids < nvalid).astype(jnp.float32)

        # filter 1: reliable samples (entropys < e_margin)
        mask1 = (ent < E_MARGIN).astype(jnp.float32) * rowmask
        count1 = jnp.sum(mask1)

        # filter 2: non-redundant, |cos(current_model_probs, softmax)| < d_margin,
        # only applied when current_model_probs is not None (flag == 1)
        f_has = (flag_ref[0] > 0).astype(jnp.float32)
        cur = cur_ref[...]                            # (1, K_pad)
        dotpc = jnp.sum(p * cur, axis=1, keepdims=True)
        pn = jnp.sqrt(jnp.sum(p * p, axis=1, keepdims=True))
        cn = jnp.sqrt(jnp.sum(cur * cur, axis=1, keepdims=True))
        inv_den = pl.reciprocal(jnp.maximum(pn, EPS) * jnp.maximum(cn, EPS),
                                approx=True)          # EUP slot, ~free
        cos = dotpc * inv_den
        mask_cos = (jnp.abs(cos) < D_MARGIN).astype(jnp.float32)
        mask2 = mask1 * (f_has * mask_cos + (1.0 - f_has))
        count2 = jnp.sum(mask2)

        # coeff re-weighted entropy loss over selected samples
        coeff = jnp.exp(-(ent - E_MARGIN))
        # mean over selected samples (NaN when none selected, same as torch)
        loss_sel = jnp.sum(mask2 * ent * coeff) / count2

        # softmax_mean_entropy(outputs) over the real batch
        pm = jnp.sum(p * rowmask, axis=0, keepdims=True) / nvalid.astype(jnp.float32)
        pm_logpm = jnp.where(pm > 0.0, pm * jnp.log(jnp.maximum(pm, 1e-30)), 0.0)
        mean_ent = -jnp.sum(pm_logpm)

        loss = loss_sel - ALPHA0 * mean_ent

        # update_model_probs (moving average of selected softmax probs)
        sel_sum = jnp.sum(mask2 * p, axis=0, keepdims=True)   # (1, K_pad)
        g_nonempty = (count2 > 0.0).astype(jnp.float32)
        sel_mean = sel_sum / jnp.maximum(count2, 1.0)
        upd_with_prior = g_nonempty * (0.9 * cur + 0.1 * sel_mean) \
            + (1.0 - g_nonempty) * cur
        # no prior probs: torch returns mean of selected probs (None if empty ->
        # represented here as zeros)
        upd = f_has * upd_with_prior + (1.0 - f_has) * sel_mean
        upd_ref[...] = upd

        # scalar statistics -> SMEM
        stats_ref[0] = loss
        stats_ref[1] = count2      # reliable & non-redundant samples
        stats_ref[2] = count1      # reliable samples
        stats_ref[3] = mean_ent


def eata_forward(x, W, b, current_model_probs, has_probs, *, d_tile=512):
    """One EATA forward step.

    Returns (outputs (B, K), updated_probs (K,), stats (4,)) where
    stats = [loss, num_counts_2, num_counts_1, softmax_mean_entropy].
    """
    B = x.shape[0]
    D, K = W.shape
    x_flat = x.reshape(B, -1)
    assert x_flat.shape[1] == D

    # --- padding to TPU-friendly shapes ---
    B_pad = _round_up(max(B, 16), 16)        # bf16 sublane packing
    K_pad = _round_up(K, 128)                # lane-dense classes / MXU N width
    D_128 = _round_up(D, 128)
    tD = min(d_tile, D_128)                  # reduction tile over features
    D_pad = _round_up(D_128, tD)
    n_k = D_pad // tD

    # bf16 matmul inputs (f32 accumulation in-kernel) -> halve HBM traffic.
    x_p = jnp.zeros((B_pad, D_pad), jnp.bfloat16).at[:B, :D].set(
        x_flat.astype(jnp.bfloat16))
    w_p = jnp.zeros((D_pad, K_pad), jnp.bfloat16).at[:D, :K].set(
        W.astype(jnp.bfloat16))
    b_p = jnp.full((1, K_pad), NEG_BIG, jnp.float32).at[0, :K].set(
        b.reshape(K).astype(jnp.float32))
    cur_p = jnp.zeros((1, K_pad), jnp.float32).at[0, :K].set(
        current_model_probs.reshape(K).astype(jnp.float32))

    nvalid = jnp.array([B], dtype=jnp.int32)
    flag = jnp.array([1 if has_probs else 0], dtype=jnp.int32)

    out_shapes = (
        jax.ShapeDtypeStruct((B_pad, K_pad), jnp.float32),   # logits (padded)
        jax.ShapeDtypeStruct((1, K_pad), jnp.float32),       # updated_probs
        jax.ShapeDtypeStruct((4,), jnp.float32),             # scalar stats
    )
    in_specs = [
        pl.BlockSpec(memory_space=pltpu.MemorySpace.SMEM),   # nvalid
        pl.BlockSpec(memory_space=pltpu.MemorySpace.SMEM),   # flag
        pl.BlockSpec((B_pad, tD), lambda k: (0, k)),         # x_flat tiles
        pl.BlockSpec((tD, K_pad), lambda k: (k, 0)),         # W tiles
        pl.BlockSpec((1, K_pad), lambda k: (0, 0)),          # bias
        pl.BlockSpec((1, K_pad), lambda k: (0, 0)),          # current probs
    ]
    out_specs = (
        pl.BlockSpec((B_pad, K_pad), lambda k: (0, 0)),
        pl.BlockSpec((1, K_pad), lambda k: (0, 0)),
        pl.BlockSpec(memory_space=pltpu.MemorySpace.SMEM),
    )

    # advisory cost estimate for XLA scheduling around the custom call
    bytes_in = x_p.size * 2 + w_p.size * 2 + (b_p.size + cur_p.size) * 4 + 8
    bytes_out = B_pad * K_pad * 4 + K_pad * 4 + 16
    cost = pl.CostEstimate(flops=int(2 * B_pad * D_pad * K_pad),
                           transcendentals=int(4 * B_pad * K_pad),
                           bytes_accessed=int(bytes_in + bytes_out))

    # VMEM budget: double-buffered bf16 input tiles + f32 accumulator +
    # resident outputs + headroom; clamped so it also fits v7x's 64 MiB core.
    need = (2 * (B_pad * tD + tD * K_pad) * 2          # bf16 input tiles x2 buf
            + 3 * B_pad * K_pad * 4                    # acc + logits buffers
            + 16 * K_pad * 4)                          # bias / cur / upd
    vmem_limit = int(min(max(need + (8 << 20), 32 << 20), 56 << 20))

    logits_p, upd_p, stats = pl.pallas_call(
        eata_kernel,
        grid=(n_k,),
        out_shape=out_shapes,
        in_specs=in_specs,
        out_specs=out_specs,
        scratch_shapes=[pltpu.VMEM((B_pad, K_pad), jnp.float32)],
        compiler_params=pltpu.CompilerParams(
            dimension_semantics=("arbitrary",),
            vmem_limit_bytes=vmem_limit),
        cost_estimate=cost,
    )(nvalid, flag, x_p, w_p, b_p, cur_p)

    outputs = logits_p[:B, :K]
    updated_probs = upd_p[0, :K]
    return outputs, updated_probs, stats


if __name__ == "__main__":
    key = jax.random.PRNGKey(0)
    kx, kw = jax.random.split(key, 2)

    # Small shapes: batch=8, NCHW image (4, 16, 16) -> D=1024, K=16 classes.
    B, C, H, Wd = 8, 4, 16, 16
    K = 16
    D = C * H * Wd

    x = jax.random.normal(kx, (B, C, H, Wd), dtype=jnp.float32)   # NCHW input
    # Deterministic synthetic classifier parameters (the wrapped "model").
    W = 0.05 * jax.random.normal(kw, (D, K), dtype=jnp.float32)
    b = jnp.zeros((K,), dtype=jnp.float32)

    # Step 1: module starts with current_model_probs = None -> flag = 0.
    out1, upd1, stats1 = eata_forward(
        x, W, b, jnp.zeros((K,), jnp.float32), has_probs=False)

    # Step 2: moving-average probs from step 1 (reset_model_probs) -> flag = 1.
    out2, upd2, stats2 = eata_forward(x, W, b, upd1, has_probs=True)

    jax.block_until_ready((out1, upd1, stats1, out2, upd2, stats2))
    print("KERNEL_OK")
</pallas_src>

<mosaic_0001>
module attributes {stable_mosaic.version = 11 : i64} {
  func.func @eata_kernel(%arg0: i32, %arg1: memref<1xi32, #tpu.memory_space<smem>>, %arg2: memref<1xi32, #tpu.memory_space<smem>>, %arg3: memref<16x512xbf16, #tpu.memory_space<vmem>>, %arg4: memref<512x128xbf16, #tpu.memory_space<vmem>>, %arg5: memref<1x128xf32, #tpu.memory_space<vmem>>, %arg6: memref<1x128xf32, #tpu.memory_space<vmem>>, %arg7: memref<16x128xf32, #tpu.memory_space<vmem>>, %arg8: memref<1x128xf32, #tpu.memory_space<vmem>>, %arg9: memref<4xf32, #tpu.memory_space<smem>>, %arg10: memref<16x128xf32, #tpu.memory_space<vmem>>) attributes {dimension_semantics = [#tpu.dimension_semantics<arbitrary>], iteration_bounds = array<i64: 2>, scalar_prefetch = 0 : i64, scratch_operands = 1 : i64, tpu.core_type = #tpu.core_type<tc>, window_params = [{transform_indices = @transform_0, window_bounds = array<i64: 1>}, {transform_indices = @transform_1, window_bounds = array<i64: 1>}, {transform_indices = @transform_2, window_bounds = array<i64: 16, 512>}, {transform_indices = @transform_3, window_bounds = array<i64: 512, 128>}, {pipeline_mode = #tpu.pipeline_mode<synchronous>, transform_indices = @transform_4, window_bounds = array<i64: 1, 128>}, {pipeline_mode = #tpu.pipeline_mode<synchronous>, transform_indices = @transform_5, window_bounds = array<i64: 1, 128>}, {pipeline_mode = #tpu.pipeline_mode<synchronous>, transform_indices = @transform_6, window_bounds = array<i64: 16, 128>}, {pipeline_mode = #tpu.pipeline_mode<synchronous>, transform_indices = @transform_7, window_bounds = array<i64: 1, 128>}, {transform_indices = @transform_8, window_bounds = array<i64: 4>}]} {
    %c0_i32 = arith.constant 0 : i32
    %0 = arith.cmpi eq, %arg0, %c0_i32 : i32
    %1 = arith.extui %0 : i1 to i32
    %c0_i32_0 = arith.constant 0 : i32
    %2 = arith.cmpi ne, %1, %c0_i32_0 : i32
    scf.if %2 {
      %cst_9 = arith.constant 0.000000e+00 : f32
      %12 = vector.broadcast %cst_9 : f32 to vector<16x128xf32>
      %c0_10 = arith.constant 0 : index
      %c0_11 = arith.constant 0 : index
      %13 = vector.load %arg10[%c0_10, %c0_11] : memref<16x128xf32, #tpu.memory_space<vmem>>, vector<16x128xf32>
      tpu.vector_store %arg10[%c0_10, %c0_11], %12 {strides = array<i32>} : memref<16x128xf32, #tpu.memory_space<vmem>>, vector<16x128xf32>,
    } else {
    }
    %c0 = arith.constant 0 : index
    %c0_1 = arith.constant 0 : index
    %3 = vector.load %arg10[%c0, %c0_1] : memref<16x128xf32, #tpu.memory_space<vmem>>, vector<16x128xf32>
    %c0_2 = arith.constant 0 : index
    %c0_3 = arith.constant 0 : index
    %4 = vector.load %arg3[%c0_2, %c0_3] : memref<16x512xbf16, #tpu.memory_space<vmem>>, vector<16x512xbf16>
    %c0_4 = arith.constant 0 : index
    %c0_5 = arith.constant 0 : index
    %5 = vector.load %arg4[%c0_4, %c0_5] : memref<512x128xbf16, #tpu.memory_space<vmem>>, vector<512x128xbf16>
    %cst = arith.constant dense<0.000000e+00> : vector<16x128xf32>
    %6 = tpu.matmul %4, %5, %cst {dimension_numbers = #tpu.dot_dimension_numbers<[1], [0], [0], [1], [0, 0, 1, 1], [], []>} : vector<16x512xbf16>, vector<512x128xbf16>, vector<16x128xf32> -> vector<16x128xf32>
    %7 = arith.addf %3, %6 : vector<16x128xf32>
    %c0_6 = arith.constant 0 : index
    %c0_7 = arith.constant 0 : index
    %8 = vector.load %arg10[%c0_6, %c0_7] : memref<16x128xf32, #tpu.memory_space<vmem>>, vector<16x128xf32>
    tpu.vector_store %arg10[%c0_6, %c0_7], %7 {strides = array<i32>} : memref<16x128xf32, #tpu.memory_space<vmem>>, vector<16x128xf32>,
    %c1_i32 = arith.constant 1 : i32
    %9 = arith.cmpi eq, %arg0, %c1_i32 : i32
    %10 = arith.extui %9 : i1 to i32
    %c0_i32_8 = arith.constant 0 : i32
    %11 = arith.cmpi ne, %10, %c0_i32_8 : i32
    scf.if %11 {
      %c0_9 = arith.constant 0 : index
      %c0_10 = arith.constant 0 : index
      %12 = vector.load %arg10[%c0_9, %c0_10] : memref<16x128xf32, #tpu.memory_space<vmem>>, vector<16x128xf32>
      %c0_11 = arith.constant 0 : index
      %c0_12 = arith.constant 0 : index
      %13 = vector.load %arg5[%c0_11, %c0_12] : memref<1x128xf32, #tpu.memory_space<vmem>>, vector<1x128xf32>
      %14 = vector.broadcast %13 : vector<1x128xf32> to vector<16x128xf32>
      %15 = arith.addf %12, %14 : vector<16x128xf32>
      %c0_13 = arith.constant 0 : index
      %c0_14 = arith.constant 0 : index
      %16 = vector.load %arg7[%c0_13, %c0_14] : memref<16x128xf32, #tpu.memory_space<vmem>>, vector<16x128xf32>
      tpu.vector_store %arg7[%c0_13, %c0_14], %15 {strides = array<i32>} : memref<16x128xf32, #tpu.memory_space<vmem>>, vector<16x128xf32>,
      %cst_15 = arith.constant dense<0xFF800000> : vector<16xf32>
      %17 = vector.multi_reduction <maximumf>, %15, %cst_15 [1] : vector<16x128xf32> to vector<16xf32>
      %18 = vector.shape_cast %17 : vector<16xf32> to vector<16x1xf32>
      %19 = vector.broadcast %18 : vector<16x1xf32> to vector<16x128xf32>
      %20 = arith.subf %15, %19 : vector<16x128xf32>
      %21 = math.exp %20 : vector<16x128xf32>
      %cst_16 = arith.constant dense<0.000000e+00> : vector<16xf32>
      %22 = vector.multi_reduction <add>, %21, %cst_16 [1] : vector<16x128xf32> to vector<16xf32>
      %23 = vector.shape_cast %22 : vector<16xf32> to vector<16x1xf32>
      %24 = math.log %23 : vector<16x1xf32>
      %25 = vector.broadcast %24 : vector<16x1xf32> to vector<16x128xf32>
      %26 = arith.subf %20, %25 : vector<16x128xf32>
      %27 = math.exp %26 : vector<16x128xf32>
      %28 = arith.mulf %27, %26 : vector<16x128xf32>
      %cst_17 = arith.constant dense<0.000000e+00> : vector<16xf32>
      %29 = vector.multi_reduction <add>, %28, %cst_17 [1] : vector<16x128xf32> to vector<16xf32>
      %30 = vector.shape_cast %29 : vector<16xf32> to vector<16x1xf32>
      %cst_18 = arith.constant 0.000000e+00 : f32
      %31 = vector.broadcast %cst_18 : f32 to vector<16x1xf32>
      %32 = arith.subf %31, %30 : vector<16x1xf32>
      %c0_19 = arith.constant 0 : index
      %33 = memref.load %arg1[%c0_19] : memref<1xi32, #tpu.memory_space<smem>>
      %34 = tpu.iota {dimensions = array<i32: 0>} : vector<16x1xi32>
      %35 = vector.broadcast %33 : i32 to vector<16x1xi32>
      %36 = arith.cmpi slt, %34, %35 : vector<16x1xi32>
      %37 = arith.extui %36 : vector<16x1xi1> to vector<16x1xi32>
      %38 = arith.sitofp %37 : vector<16x1xi32> to vector<16x1xf32>
      %cst_20 = arith.constant 2.45387769 : f32
      %39 = vector.broadcast %cst_20 : f32 to vector<16x1xf32>
      %40 = arith.cmpf olt, %32, %39 : vector<16x1xf32>
      %41 = arith.extui %40 : vector<16x1xi1> to vector<16x1xi32>
      %42 = arith.sitofp %41 : vector<16x1xi32> to vector<16x1xf32>
      %43 = arith.mulf %42, %38 : vector<16x1xf32>
      %44 = vector.shape_cast %43 : vector<16x1xf32> to vector<1x16x1xf32>
      %cst_21 = arith.constant dense<0.000000e+00> : vector<1xf32>
      %45 = vector.multi_reduction <add>, %44, %cst_21 [1, 2] : vector<1x16x1xf32> to vector<1xf32>
      %46 = vector.shape_cast %45 : vector<1xf32> to vector<1x1x1xf32>
      %47 = vector.extract %46[0, 0, 0] : f32 from vector<1x1x1xf32>
      %c0_22 = arith.constant 0 : index
      %48 = memref.load %arg2[%c0_22] : memref<1xi32, #tpu.memory_space<smem>>
      %c0_i32_23 = arith.constant 0 : i32
      %49 = arith.cmpi sgt, %48, %c0_i32_23 : i32
      %50 = arith.extui %49 : i1 to i32
      %51 = arith.sitofp %50 : i32 to f32
      %c0_24 = arith.constant 0 : index
      %c0_25 = arith.constant 0 : index
      %52 = vector.load %arg6[%c0_24, %c0_25] : memref<1x128xf32, #tpu.memory_space<vmem>>, vector<1x128xf32>
      %53 = vector.broadcast %52 : vector<1x128xf32> to vector<16x128xf32>
      %54 = arith.mulf %27, %53 : vector<16x128xf32>
      %cst_26 = arith.constant dense<0.000000e+00> : vector<16xf32>
      %55 = vector.multi_reduction <add>, %54, %cst_26 [1] : vector<16x128xf32> to vector<16xf32>
      %56 = vector.shape_cast %55 : vector<16xf32> to vector<16x1xf32>
      %57 = arith.mulf %27, %27 : vector<16x128xf32>
      %cst_27 = arith.constant dense<0.000000e+00> : vector<16xf32>
      %58 = vector.multi_reduction <add>, %57, %cst_27 [1] : vector<16x128xf32> to vector<16xf32>
      %59 = vector.shape_cast %58 : vector<16xf32> to vector<16x1xf32>
      %60 = math.sqrt %59 : vector<16x1xf32>
      %61 = arith.mulf %52, %52 : vector<1x128xf32>
      %cst_28 = arith.constant dense<0.000000e+00> : vector<1xf32>
      %62 = vector.multi_reduction <add>, %61, %cst_28 [1] : vector<1x128xf32> to vector<1xf32>
      %63 = vector.shape_cast %62 : vector<1xf32> to vector<1x1xf32>
      %64 = math.sqrt %63 : vector<1x1xf32>
      %cst_29 = arith.constant 9.99999993E-9 : f32
      %65 = vector.broadcast %cst_29 : f32 to vector<16x1xf32>
      %66 = arith.maximumf %60, %65 : vector<16x1xf32>
      %cst_30 = arith.constant 9.99999993E-9 : f32
      %67 = vector.broadcast %cst_30 : f32 to vector<1x1xf32>
      %68 = arith.maximumf %64, %67 : vector<1x1xf32>
      %69 = vector.broadcast %68 : vector<1x1xf32> to vector<16x1xf32>
      %70 = arith.mulf %66, %69 : vector<16x1xf32>
      %71 = tpu.reciprocal %70 {approx = true} : vector<16x1xf32> -> vector<16x1xf32>
      %72 = arith.mulf %56, %71 : vector<16x1xf32>
      %73 = math.absf %72 : vector<16x1xf32>
      %cst_31 = arith.constant 5.000000e-02 : f32
      %74 = vector.broadcast %cst_31 : f32 to vector<16x1xf32>
      %75 = arith.cmpf olt, %73, %74 : vector<16x1xf32>
      %76 = arith.extui %75 : vector<16x1xi1> to vector<16x1xi32>
      %77 = arith.sitofp %76 : vector<16x1xi32> to vector<16x1xf32>
      %78 = vector.broadcast %51 : f32 to vector<16x1xf32>
      %79 = arith.mulf %78, %77 : vector<16x1xf32>
      %cst_32 = arith.constant 1.000000e+00 : f32
      %80 = arith.subf %cst_32, %51 : f32
      %81 = vector.broadcast %80 : f32 to vector<16x1xf32>
      %82 = arith.addf %79, %81 : vector<16x1xf32>
      %83 = arith.mulf %43, %82 : vector<16x1xf32>
      %84 = vector.shape_cast %83 : vector<16x1xf32> to vector<1x16x1xf32>
      %cst_33 = arith.constant dense<0.000000e+00> : vector<1xf32>
      %85 = vector.multi_reduction <add>, %84, %cst_33 [1, 2] : vector<1x16x1xf32> to vector<1xf32>
      %86 = vector.shape_cast %85 : vector<1xf32> to vector<1x1x1xf32>
      %87 = vector.extract %86[0, 0, 0] : f32 from vector<1x1x1xf32>
      %cst_34 = arith.constant 2.45387769 : f32
      %88 = vector.broadcast %cst_34 : f32 to vector<16x1xf32>
      %89 = arith.subf %32, %88 : vector<16x1xf32>
      %cst_35 = arith.constant 0.000000e+00 : f32
      %90 = vector.broadcast %cst_35 : f32 to vector<16x1xf32>
      %91 = arith.subf %90, %89 : vector<16x1xf32>
      %92 = math.exp %91 : vector<16x1xf32>
      %93 = arith.mulf %83, %32 : vector<16x1xf32>
      %94 = arith.mulf %93, %92 : vector<16x1xf32>
      %95 = vector.shape_cast %94 : vector<16x1xf32> to vector<1x16x1xf32>
      %cst_36 = arith.constant dense<0.000000e+00> : vector<1xf32>
      %96 = vector.multi_reduction <add>, %95, %cst_36 [1, 2] : vector<1x16x1xf32> to vector<1xf32>
      %97 = vector.shape_cast %96 : vector<1xf32> to vector<1x1x1xf32>
      %98 = vector.extract %97[0, 0, 0] : f32 from vector<1x1x1xf32>
      %99 = arith.divf %98, %87 : f32
      %100 = vector.broadcast %38 : vector<16x1xf32> to vector<16x128xf32>
      %101 = arith.mulf %27, %100 : vector<16x128xf32>
      %cst_37 = arith.constant dense<0.000000e+00> : vector<128xf32>
      %102 = vector.multi_reduction <add>, %101, %cst_37 [0] : vector<16x128xf32> to vector<128xf32>
      %103 = vector.shape_cast %102 : vector<128xf32> to vector<1x128xf32>
      %104 = arith.sitofp %33 : i32 to f32
      %105 = vector.broadcast %104 : f32 to vector<1x128xf32>
      %106 = arith.divf %103, %105 : vector<1x128xf32>
      %cst_38 = arith.constant 0.000000e+00 : f32
      %107 = vector.broadcast %cst_38 : f32 to vector<1x128xf32>
      %108 = arith.cmpf ogt, %106, %107 : vector<1x128xf32>
      %cst_39 = arith.constant 1.000000e-30 : f32
      %109 = vector.broadcast %cst_39 : f32 to vector<1x128xf32>
      %110 = arith.maximumf %106, %109 : vector<1x128xf32>
      %111 = math.log %110 : vector<1x128xf32>
      %112 = arith.mulf %106, %111 : vector<1x128xf32>
      %cst_40 = arith.constant 0.000000e+00 : f32
      %113 = vector.broadcast %cst_40 : f32 to vector<1x128xf32>
      %114 = arith.select %108, %112, %113 : vector<1x128xi1>, vector<1x128xf32>
      %115 = vector.shape_cast %114 : vector<1x128xf32> to vector<1x1x128xf32>
      %cst_41 = arith.constant dense<0.000000e+00> : vector<1xf32>
      %116 = vector.multi_reduction <add>, %115, %cst_41 [1, 2] : vector<1x1x128xf32> to vector<1xf32>
      %117 = vector.shape_cast %116 : vector<1xf32> to vector<1x1x1xf32>
      %118 = vector.extract %117[0, 0, 0] : f32 from vector<1x1x1xf32>
      %cst_42 = arith.constant 0.000000e+00 : f32
      %119 = arith.subf %cst_42, %118 : f32
      %cst_43 = arith.constant 5.000000e-01 : f32
      %120 = arith.mulf %cst_43, %119 : f32
      %121 = arith.subf %99, %120 : f32
      %122 = vector.broadcast %83 : vector<16x1xf32> to vector<16x128xf32>
      %123 = arith.mulf %122, %27 : vector<16x128xf32>
      %cst_44 = arith.constant dense<0.000000e+00> : vector<128xf32>
      %124 = vector.multi_reduction <add>, %123, %cst_44 [0] : vector<16x128xf32> to vector<128xf32>
      %125 = vector.shape_cast %124 : vector<128xf32> to vector<1x128xf32>
      %cst_45 = arith.constant 0.000000e+00 : f32
      %126 = arith.cmpf ogt, %87, %cst_45 : f32
      %127 = arith.extui %126 : i1 to i32
      %128 = arith.sitofp %127 : i32 to f32
      %cst_46 = arith.constant 1.000000e+00 : f32
      %129 = arith.maximumf %87, %cst_46 : f32
      %130 = vector.broadcast %129 : f32 to vector<1x128xf32>
      %131 = arith.divf %125, %130 : vector<1x128xf32>
      %cst_47 = arith.constant 0.899999976 : f32
      %132 = vector.broadcast %cst_47 : f32 to vector<1x128xf32>
      %133 = arith.mulf %132, %52 : vector<1x128xf32>
      %cst_48 = arith.constant 1.000000e-01 : f32
      %134 = vector.broadcast %cst_48 : f32 to vector<1x128xf32>
      %135 = arith.mulf %134, %131 : vector<1x128xf32>
      %136 = arith.addf %133, %135 : vector<1x128xf32>
      %137 = vector.broadcast %128 : f32 to vector<1x128xf32>
      %138 = arith.mulf %137, %136 : vector<1x128xf32>
      %cst_49 = arith.constant 1.000000e+00 : f32
      %139 = arith.subf %cst_49, %128 : f32
      %140 = vector.broadcast %139 : f32 to vector<1x128xf32>
      %141 = arith.mulf %140, %52 : vector<1x128xf32>
      %142 = arith.addf %138, %141 : vector<1x128xf32>
      %143 = vector.broadcast %51 : f32 to vector<1x128xf32>
      %144 = arith.mulf %143, %142 : vector<1x128xf32>
      %cst_50 = arith.constant 1.000000e+00 : f32
      %145 = arith.subf %cst_50, %51 : f32
      %146 = vector.broadcast %145 : f32 to vector<1x128xf32>
      %147 = arith.mulf %146, %131 : vector<1x128xf32>
      %148 = arith.addf %144, %147 : vector<1x128xf32>
      %c0_51 = arith.constant 0 : index
      %c0_52 = arith.constant 0 : index
      %149 = vector.load %arg8[%c0_51, %c0_52] : memref<1x128xf32, #tpu.memory_space<vmem>>, vector<1x128xf32>
      tpu.vector_store %arg8[%c0_51, %c0_52], %148 {strides = array<i32>} : memref<1x128xf32, #tpu.memory_space<vmem>>, vector<1x128xf32>,
      %c0_53 = arith.constant 0 : index
      %150 = memref.load %arg9[%c0_53] : memref<4xf32, #tpu.memory_space<smem>>
      memref.store %121, %arg9[%c0_53] : memref<4xf32, #tpu.memory_space<smem>>
      %c1 = arith.constant 1 : index
      %151 = memref.load %arg9[%c1] : memref<4xf32, #tpu.memory_space<smem>>
      memref.store %87, %arg9[%c1] : memref<4xf32, #tpu.memory_space<smem>>
      %c2 = arith.constant 2 : index
      %152 = memref.load %arg9[%c2] : memref<4xf32, #tpu.memory_space<smem>>
      memref.store %47, %arg9[%c2] : memref<4xf32, #tpu.memory_space<smem>>
      %c3 = arith.constant 3 : index
      %153 = memref.load %arg9[%c3] : memref<4xf32, #tpu.memory_space<smem>>
      memref.store %119, %arg9[%c3] : memref<4xf32, #tpu.memory_space<smem>>
    } else {
    }
    return
  }
  func.func @transform_0(%arg0: i32) -> i32 {
    %c0_i32 = arith.constant 0 : i32
    %c0_i32_0 = arith.constant 0 : i32
    return %c0_i32 : i32
  }
  func.func @transform_1(%arg0: i32) -> i32 {
    %c0_i32 = arith.constant 0 : i32
    %c0_i32_0 = arith.constant 0 : i32
    return %c0_i32 : i32
  }
  func.func @transform_2(%arg0: i32) -> (i32, i32) {
    %c0_i32 = arith.constant 0 : i32
    %c0_i32_0 = arith.constant 0 : i32
    return %c0_i32, %arg0 : i32, i32
  }
  func.func @transform_3(%arg0: i32) -> (i32, i32) {
    %c0_i32 = arith.constant 0 : i32
    %c0_i32_0 = arith.constant 0 : i32
    return %arg0, %c0_i32 : i32, i32
  }
  func.func @transform_4(%arg0: i32) -> (i32, i32) {
    %c0_i32 = arith.constant 0 : i32
    %c0_i32_0 = arith.constant 0 : i32
    %c0_i32_1 = arith.constant 0 : i32
    return %c0_i32, %c0_i32_0 : i32, i32
  }
  func.func @transform_5(%arg0: i32) -> (i32, i32) {
    %c0_i32 = arith.constant 0 : i32
    %c0_i32_0 = arith.constant 0 : i32
    %c0_i32_1 = arith.constant 0 : i32
    return %c0_i32, %c0_i32_0 : i32, i32
  }
  func.func @transform_6(%arg0: i32) -> (i32, i32) {
    %c0_i32 = arith.constant 0 : i32
    %c0_i32_0 = arith.constant 0 : i32
    %c0_i32_1 = arith.constant 0 : i32
    return %c0_i32, %c0_i32_0 : i32, i32
  }
  func.func @transform_7(%arg0: i32) -> (i32, i32) {
    %c0_i32 = arith.constant 0 : i32
    %c0_i32_0 = arith.constant 0 : i32
    %c0_i32_1 = arith.constant 0 : i32
    return %c0_i32, %c0_i32_0 : i32, i32
  }
  func.func @transform_8(%arg0: i32) -> i32 {
    %c0_i32 = arith.constant 0 : i32
    %c0_i32_0 = arith.constant 0 : i32
    return %c0_i32 : i32
  }
}

</mosaic_0001>

<bundles_post_ra>
// kernel: tpu_custom_call.1
= control target key start
LH: loop header
LB: loop body
LE: loop exit
PB: predicated region body
PF: predicated region fallthrough
CT: control target
= control target key end

     0   :  { %s1970_s0 = inlined_call_operand.<no memory space> [shape: s32[1], index: 0, kind: input, shape index: {}]   ;;  %s1971_s1 = inlined_call_operand.<no memory space> [shape: s32[1], index: 1, kind: input, shape index: {}]   ;;  %s1972_s2 = inlined_call_operand.hbm [shape: bf16[16,1024], index: 2, kind: input, shape index: {}]   ;;  %s1973_s3 = inlined_call_operand.hbm [shape: bf16[1024,128], index: 3, kind: input, shape index: {}]   ;;  %s1974_s4 = inlined_call_operand.vmem [shape: f32[1,128], index: 4, kind: input, shape index: {}]   ;;  %s1975_s5 = inlined_call_operand.vmem [shape: f32[1,128], index: 5, kind: input, shape index: {}]   ;;  %s1976_s6 = inlined_call_operand.hbm [shape: f32[16,128], index: 6, kind: output, shape index: {0}]   ;;  %s1977_s7 = inlined_call_operand.hbm [shape: f32[1,128], index: 7, kind: output, shape index: {1}]   ;;  %s1978_s8 = inlined_call_operand.hbm [shape: f32[4], index: 8, kind: output, shape index: {2}]  }
   0x1   :  { %14 = sst [smem:[#allocation3]] %s1970_s0 }
   0x2   :  { %15 = sst [smem:[#allocation4]] %s1971_s1 }
   0x3   :  { %16 = vsyncpa [#allocation6], 0 }
   0x4   :  { %18 = vsyncpa [#allocation6 + $0x1], 0 }
   0x5   :  { %19 = vsyncpa [#allocation10], 0 }
   0x6   :  { %21 = vsyncpa [#allocation10 + $0x1], 0 }
   0x7   :  { %22 = vsyncpa [#allocation7], 0 }
   0x8   :  { %23 = vsyncpa [#allocation13], 0 }
   0x9   :  { %24 = vsyncpa [#allocation8], 0  ;;  %s1636_s9 = smov 0   ;;  %s1638_s10 = smov 0  }
   0xa   :  { %s1640_s11 = smov 0   ;;  %s1642_s12 = smov 0  }
   0xb LB: > { %s1655_s0 = sadd.s32 4294967295, %s1568_s12   ;;  %s1658_s1 = sadd.s32 1, %s1568_s12   ;;  %s1568_s12 = sphi %s1642_s12, %s1987_s12   ;;  %s1564_s11 = sphi %s1640_s11, %s1986_s11   ;;  %s1560_s10 = sphi %s1638_s10, %s1985_s10   ;;  %s1556_s9 = sphi %s1636_s9, %s1984_s9  }
   0xc   : > { %s76_s13 = ssub.s32 %s1568_s12, %s1658_s1  ;;  %s79_s14 = sadd.s32 1, %s1564_s11 }
   0xd   : > { %p77_p0 = scmp.eq.s32.totalorder %s76_s13, 0  ;;  %p86_p1 = scmp.ne.s32.totalorder %s1564_s11, %s1560_s10 }
   0xe   : > { %p87_p2 = scmp.eq.s32.totalorder %s1568_s12, 0  ;;  %p92_p3 = scmp.ne.s32.totalorder %s1560_s10, %s1556_s9 }
   0xf   : > { %s1668_s15 = scalar_select %p77_p0, %s1564_s11, %s79_s14  }
  0x10   : > { %p88_p4 = por %p87_p2, %p86_p1  ;;  %p93_p5 = scmp.eq.s32.totalorder %s1655_s0, 0 }
  0x11   : > { %p1270_p6 = scmp.lt.s32.totalorder %s1568_s12, 2  ;;  %s1677_s17 = sand.u32 1, %s1564_s11  }
  0x12   : > { %p1672_p7 = por %p93_p5, %p92_p3  ;;  %s1127_s18 = sshll.u32 %s1677_s17, 5 }
  0x13   : > { %s1191_s19 = sshll.u32 %s1568_s12, 8  ;;  %s263_s23 = scalar_lea.vmem [#allocation5], %s1127_s18 }
  0x14   : > { %s1980_s16 = scalar_select %p1672_p7, 1, 0 }
  0x15   : > { %s1684_s22 = scalar_lea.hbm %s1972_s2, %s1191_s19  ;;  %s270_s24 = sshll.u32 %s263_s23, 4  ;;  %s1686_s24 = int_to_ptr.vmem [resolvable:$true] %s270_s24 }
  0x16   : > { %p1688_p8 = pnand %p1270_p6, %p88_p4  ;;  %s260_s26 = scalar_lea.sflag [#allocation6], %s1677_s17 }
  0x17   : > { %s1394_s27 = scalar_lea.hbm %s1684_s22, 512  ;;  %s1399_s30 = scalar_lea.hbm %s1972_s2, 1024 }
  0x18   : > { %p1395_p9 = scmp.ne.s32.totalorder %s1684_s22, %s1394_s27  ;;  %p1396_p10 = pneg %p1688_p8 }
  0x19   : > { %p1400_p13 = scmp.lt.u32.totalorder %s1684_s22, %s1972_s2  ;;  %p1401_p0 = scmp.lt.u32.totalorder %s1399_s30, %s1394_s27 }
  0x1a   : > { %p1397_p11 = pnand %p1396_p10, %p1395_p9  ;;  %p1403_p2 = scmp.lt.u32.totalorder %s1394_s27, %s1684_s22 }
  0x1b   : > { %p1402_p1 = por %p1401_p0, %p1400_p13 }
  0x1c   : > { %p1398_p12 = pneg %p1397_p11 }
  0x1d   : > { %p1404_p3 = por %p1403_p2, %p1402_p1 }
  0x1f   : > { %p1405_p4 = pnand %p1404_p3, %p1398_p12 }
  0x21   : > { %1408 = shalt.err (!%p1405_p4)
}
  0x22   : > { %s1409_s14 = scalar_lea.vmem %s1686_s24, 512  ;;  %s1570_s18 = smov [#allocation5]  }
  0x23   : > { %p1410_p5 = scmp.ne.s32.totalorder %s1686_s24, %s1409_s14  ;;  %s1414_s19 = sshll.u32 %s1570_s18, 4  ;;  %s1415_s19 = int_to_ptr.vmem [resolvable:$false] %s1414_s19 }
  0x24   : > { %s1416_s20 = scalar_lea.vmem %s1415_s19, 1024  ;;  %p1417_p11 = scmp.lt.s32.totalorder %s1686_s24, %s1415_s19 }
  0x25   : > { %p1412_p6 = pnand %p1410_p5, %p1396_p10  ;;  %p1418_p13 = scmp.lt.s32.totalorder %s1416_s20, %s1409_s14 }
  0x27   : > { %p1413_p9 = pneg %p1412_p6  ;;  %p1419_p0 = por %p1418_p13, %p1417_p11 }
  0x29   : > { %p1420_p1 = pnand %p1419_p0, %p1413_p9 }
  0x2b   : > { %1423 = shalt.err (!%p1420_p1)
}
  0x2c   : > { %s1571_s21 = smov 512   ;;  %s1572_s23 = smov 256  }
  0x2d   : > { %s1573_s27 = smov 16   ;;  %p1133_p12 = scmp.ge.s32.totalorder %s1568_s12, 1 }
  0x2e   : > { %1266 = dma.hbm_to_vmem [thread:$0]  (!%p1688_p8), %s1684_s22, 512, %s1686_s24, %s260_s26, %s1571_s21, %s1572_s23, %s1573_s27  }
  0x2f   : > { %p299_p2 = scmp.lt.s32.totalorder %s1568_s12, 3  ;;  %s1130_s28 = sshll.u32 %s1677_s17, 8 }
  0x30   : > { %s1192_s30 = sshll.u32 %s1568_s12, 12  ;;  %s284_s9 = scalar_lea.vmem [#allocation9], %s1130_s28 }
  0x31   : > { %p1723_p3 = pnand %p1133_p12, %p299_p2  ;;  %s291_s13 = sshll.u32 %s284_s9, 4  ;;  %s1733_s13 = int_to_ptr.vmem [resolvable:$true] %s291_s13 }
  0x32   : > { %s1731_s19 = scalar_lea.hbm %s1973_s3, %s1192_s30  ;;  %s281_s22 = scalar_lea.sflag [#allocation10], %s1677_s17 }
  0x33   : > { %s1424_s24 = scalar_lea.hbm %s1731_s19, 4096  ;;  %s1429_s20 = scalar_lea.hbm %s1973_s3, 8192 }
  0x34   : > { %p1425_p4 = scmp.ne.s32.totalorder %s1731_s19, %s1424_s24  ;;  %p1430_p9 = scmp.lt.u32.totalorder %s1731_s19, %s1973_s3 }
  0x35   : > { %p1431_p11 = scmp.lt.u32.totalorder %s1429_s20, %s1424_s24  ;;  %p1433_p0 = scmp.lt.u32.totalorder %s1424_s24, %s1731_s19 }
  0x36   : > { %p1427_p5 = pnand %p1425_p4, %p1396_p10 }
  0x37   : > { %p1432_p13 = por %p1431_p11, %p1430_p9 }
  0x38   : > { %p1428_p6 = pneg %p1427_p5 }
  0x39   : > { %p1434_p1 = por %p1433_p0, %p1432_p13 }
  0x3b   : > { %p1435_p12 = pnand %p1434_p1, %p1428_p6 }
  0x3d   : > { %1438 = shalt.err (!%p1435_p12)
}
  0x3e   : > { %s1439_s27 = scalar_lea.vmem %s1733_s13, 4096  ;;  %s1574_s28 = smov [#allocation9]  }
  0x3f   : > { %p1440_p2 = scmp.ne.s32.totalorder %s1733_s13, %s1439_s27  ;;  %s1444_s30 = sshll.u32 %s1574_s28, 4  ;;  %s1445_s30 = int_to_ptr.vmem [resolvable:$false] %s1444_s30 }
  0x40   : > { %s1446_s9 = scalar_lea.vmem %s1445_s30, 8192  ;;  %p1447_p7 = scmp.lt.s32.totalorder %s1733_s13, %s1445_s30 }
  0x41   : > { %p1442_p4 = pnand %p1440_p2, %p1396_p10  ;;  %p1448_p9 = scmp.lt.s32.totalorder %s1446_s9, %s1439_s27 }
  0x43   : > { %p1443_p5 = pneg %p1442_p4  ;;  %p1449_p11 = por %p1448_p9, %p1447_p7 }
  0x45   : > { %p1450_p13 = pnand %p1449_p11, %p1443_p5 }
  0x47   : > { %1453 = shalt.err (!%p1450_p13)
}
  0x48   : > { %s1575_s14 = smov 64   ;;  %s1576_s18 = smov 4  }
  0x49   : > { %1269 = dma.hbm_to_vmem [thread:$0]  (!%p1688_p8), %s1731_s19, 4096, %s1733_s13, %s281_s22, %s1575_s14, %s1575_s14, %s1576_s18  }
  0x4a   : > { %303 = sbr.rel (%p1723_p3) target bundleno = 1218 (0x4c2), region = 44  ;;  %s305_s24 = sand.u32 (!%p1723_p3), 1, %s1560_s10  }
  0x4b   : > { %s1134_s12 = sshll.u32 (!%p1723_p3), %s305_s24, 5  ;;  %s306_s26 = scalar_lea.sflag (!%p1723_p3), [#allocation6], %s305_s24 }
  0x4c   : > { %s1764_s20 = scalar_lea.vmem (!%p1723_p3), [#allocation5], %s1134_s12  ;;  %p1983_p7 = scmp.ne.s32.totalorder (!%p1723_p3), %s1980_s16, 0 }
  0x51   : > { %1535 = dma.done.wait (%p1983_p7), %s306_s26, 512  }
  0x52   : > { %1537 = vsyncadd (%p1983_p7), %s306_s26, 4294966784  ;;  %s1135_s21 = sshll.u32 %s305_s24, 8  ;;  %s315_s25 = scalar_lea.sflag [#allocation10], %s305_s24 }
  0x53   : > { %s1770_s17 = scalar_lea.vmem [#allocation9], %s1135_s21 }
  0x54   : > { %1539 = dma.done.wait (%p1983_p7), %s315_s25, 4096  }
  0x55   : > { %1541 = vsyncadd (%p1983_p7), %s315_s25, 4294963200  ;;  %p1136_p8 = scmp.ne.s32.totalorder %s1655_s0, 0 }
  0x56   : > { %v1577_v0 = vmov (!%p1136_p8), 0.0  }
  0x57   : > { %357 = sbr.rel (%p1136_p8) target bundleno = 94 (0x5e), region = 56  ;;  %358 = vst [vmem:[#allocation2] sm:$0xff] (!%p1136_p8), %v1577_v0  ;;  %359 = vst [vmem:[#allocation2 + $0x8] sm:$0xff] (!%p1136_p8), %v1577_v0 }
  0x5e PF: > { %v1322_v1 = vld [vmem:[%s1770_s17 + $0x40] sm:$0xff]   ;;  %v1326_v5 = vld [vmem:[%s1770_s17 + $0x48] sm:$0xff]   ;;  %v1330_v9 = vld [vmem:[%s1770_s17 + $0x50] sm:$0xff]   ;;  %p1173_p10 = scmp.ne.s32.totalorder %s1655_s0, 1 }
  0x5f   : > { %v1323_v2 = vld [vmem:[%s1770_s17 + $0xc0] sm:$0xff]   ;;  %1193 = vmatprep.subr.bf16.mxu0 %v1322_v1  ;;  %v1327_v6 = vld [vmem:[%s1770_s17 + $0xc8] sm:$0xff]   ;;  %v1331_v10 = vld [vmem:[%s1770_s17 + $0xd0] sm:$0xff]   ;;  %vm847_vm0 = vcmask (!%p1173_p10), 1040384   ;;  %s777_s22 = sld [smem:[#allocation3]] (!%p1173_p10)  ;;  %vm796_vm9 = vcmask (!%p1173_p10), 7168  }
  0x60   : > { %v1324_v3 = vld [vmem:[%s1770_s17] sm:$0xff]   ;;  %1215 = vmatprep.subr.bf16.mxu1 %v1323_v2  ;;  %v1328_v7 = vld [vmem:[%s1770_s17 + $0x8] sm:$0xff]   ;;  %v1332_v11 = vld [vmem:[%s1770_s17 + $0x10] sm:$0xff]   ;;  %s1854_s27 = sld [smem:[#allocation4]] (!%p1173_p10)  ;;  %s1579_s24 = smov (!%p1173_p10), 1.0  }
  0x61   : > { %v1325_v4 = vld [vmem:[%s1770_s17 + $0x80] sm:$0xff]   ;;  %1194 = vmatpush3.bf16.msra.mxu0 %v1324_v3  ;;  %v1329_v8 = vld [vmem:[%s1770_s17 + $0x88] sm:$0xff]   ;;  %v1333_v12 = vld [vmem:[%s1770_s17 + $0x90] sm:$0xff]  }
  0x62   : > { %1216 = vmatpush3.bf16.msra.mxu1 %v1325_v4  ;;  %1195 = vmatprep.subr.bf16.mxu0 %v1326_v5  ;;  %v1334_v13 = vld [vmem:[%s1770_s17 + $0x58] sm:$0xff]   ;;  %v1338_v17 = vld [vmem:[%s1770_s17 + $0x60] sm:$0xff]   ;;  %v1342_v21 = vld [vmem:[%s1770_s17 + $0x68] sm:$0xff]  }
  0x63   : > { %1217 = vmatprep.subr.bf16.mxu1 %v1327_v6  ;;  %v1335_v14 = vld [vmem:[%s1770_s17 + $0xd8] sm:$0xff]   ;;  %v1339_v18 = vld [vmem:[%s1770_s17 + $0xe0] sm:$0xff]   ;;  %v1343_v22 = vld [vmem:[%s1770_s17 + $0xe8] sm:$0xff]  }
  0x64   : > { %v1336_v15 = vld [vmem:[%s1770_s17 + $0x18] sm:$0xff]   ;;  %v1340_v19 = vld [vmem:[%s1770_s17 + $0x20] sm:$0xff]   ;;  %v1344_v23 = vld [vmem:[%s1770_s17 + $0x28] sm:$0xff]  }
  0x65   : > { %1196 = vmatpush3.bf16.msra.mxu0 %v1328_v7  ;;  %v1337_v16 = vld [vmem:[%s1770_s17 + $0x98] sm:$0xff]   ;;  %v1341_v20 = vld [vmem:[%s1770_s17 + $0xa0] sm:$0xff]   ;;  %v1345_v24 = vld [vmem:[%s1770_s17 + $0xa8] sm:$0xff]   ;;  %s937_s23 = scvt.s32.f32 (!%p1173_p10), %s777_s22 }
  0x66   : > { %1218 = vmatpush3.bf16.msra.mxu1 %v1329_v8  ;;  %1197 = vmatprep.subr.bf16.mxu0 %v1330_v9  ;;  %v1346_v25 = vld [vmem:[%s1770_s17 + $0x70] sm:$0xff]   ;;  %v1350_v29 = vld [vmem:[%s1770_s17 + $0x78] sm:$0xff]   ;;  %p810_p3 = scmp.gt.s32.totalorder (!%p1173_p10), %s1854_s27, 0 }
  0x67   : > { %1219 = vmatprep.subr.bf16.mxu1 %v1331_v10  ;;  %v1347_v26 = vld [vmem:[%s1770_s17 + $0xf0] sm:$0xff]   ;;  %v1351_v30 = vld [vmem:[%s1770_s17 + $0xf8] sm:$0xff]  }
  0x68   : > { %v1348_v27 = vld [vmem:[%s1770_s17 + $0x30] sm:$0xff]   ;;  %v1352_v31 = vld [vmem:[%s1770_s17 + $0x38] sm:$0xff]  }
  0x69   : > { %1198 = vmatpush3.bf16.msra.mxu0 %v1332_v11  ;;  %v1349_v28 = vld [vmem:[%s1770_s17 + $0xb0] sm:$0xff]   ;;  %v1353_v32 = vld [vmem:[%s1770_s17 + $0xb8] sm:$0xff]  }
  0x6a   : > { %1220 = vmatpush3.bf16.msra.mxu1 %v1333_v12  ;;  %1199 = vmatprep.subr.bf16.mxu0 %v1334_v13  ;;  %v1354_v33 = vld [vmem:[%s1764_s20] ss:$16 sps:$4 sm:$0xff]   ;;  %v1356_v34 = vld [vmem:[%s1764_s20 + $0x4] ss:$16 sps:$4 sm:$0xff]   ;;  %v1357_v35 = vld [vmem:[%s1764_s20 + $0x8] ss:$16 sps:$4 sm:$0xff]  }
  0x6b   : > { %1221 = vmatprep.subr.bf16.mxu1 %v1335_v14  ;;  %v1359_v36 = vld [vmem:[%s1764_s20 + $0xc] ss:$16 sps:$4 sm:$0xff]   ;;  %674 = vmatprep.mubr.bf16.mxu0 %v1356_v34  ;;  %v360_v46 = vld [vmem:[#allocation2] sm:$0xff] }
  0x6c   : > { %715 = vmatprep.mubr.bf16.mxu1 %v1359_v36  ;;  %v361_v51 = vld [vmem:[#allocation2 + $0x8] sm:$0xff]  ;;  %v1174_v56 = vld [vmem:[%s1974_s4] ss:$0 sm:$0xff] (!%p1173_p10) }
  0x6d   : > { %1200 = vmatpush3.bf16.msra.mxu0 %v1336_v15  ;;  %v1820_v4 = vld [vmem:[%s1975_s5] sm:$0x1] (!%p1173_p10)  ;;  %v778_v15 = vlaneseq (!%p1173_p10) }
  0x6e   : > { %1222 = vmatpush3.bf16.msra.mxu1 %v1337_v16  ;;  %1201 = vmatprep.subr.bf16.mxu0 %v1338_v17  ;;  %v846_v5 = vmul.f32 (!%p1173_p10), %v1820_v4, %v1820_v4 }
  0x6f   : > { %1223 = vmatprep.subr.bf16.mxu1 %v1339_v18  ;;  %v1825_v18 = vshrl.u32 (!%p1173_p10), %v778_v15, 7 }
  0x70   : > { %v848_v6 = vsel (!%p1173_p10), %vm847_vm0, %v846_v5, 0.0 }
  0x71   : > { %1202 = vmatpush3.bf16.msra.mxu0 %v1340_v19  ;;  %v817_v19 = vsub.s32 (!%p1173_p10), 0, %v1825_v18 }
  0x72   : > { %1224 = vmatpush3.bf16.msra.mxu1 %v1341_v20  ;;  %1203 = vmatprep.subr.bf16.mxu0 %v1342_v21 }
  0x73   : > { %1225 = vmatprep.subr.bf16.mxu1 %v1343_v22  ;;  %v818_v22 = vrot.slane (!%p1173_p10), %v1820_v4, %v817_v19 }
  0x75   : > { %1204 = vmatpush3.bf16.msra.mxu0 %v1344_v23 }
  0x76   : > { %1226 = vmatpush3.bf16.msra.mxu1 %v1345_v24  ;;  %1205 = vmatprep.subr.bf16.mxu0 %v1346_v25 }
  0x77   : > { %1227 = vmatprep.subr.bf16.mxu1 %v1347_v26 }
  0x79   : > { %1206 = vmatpush3.bf16.msra.mxu0 %v1348_v27 }
  0x7a   : > { %1228 = vmatpush3.bf16.msra.mxu1 %v1349_v28  ;;  %1207 = vmatprep.subr.bf16.mxu0 %v1350_v29  ;;  %v780_v29 = vadd.s32 (!%p1173_p10), 8, %v1825_v18 }
  0x7b   : > { %1229 = vmatprep.subr.bf16.mxu1 %v1351_v30  ;;  %v781_v30 = vstv (!%p1173_p10), %s777_s22 }
  0x7c   : > { %vm783_vm1 = vcmp.lt.s32.totalorder (!%p1173_p10), %v780_v29, %v781_v30  ;;  %vm782_vm2 = vcmp.lt.s32.totalorder (!%p1173_p10), %v1825_v18, %v781_v30 }
  0x7d   : > { %1208 = vmatpush3.bf16.msra.mxu0 %v1352_v31 }
  0x7e   : > { %1230 = vmatpush3.bf16.msra.mxu1 %v1353_v32  ;;  %v1578_v32 = vmov (!%p1173_p10), 0.0  }
  0x7f   : > { %v1175_v34 = vsel (!%p1173_p10), %vm782_vm2, 1.0, %v1578_v32 }
  0x80   : > { %675 = vmatmul.mubr.bf16.vlgmr.msra.gmra.mrb[0].mxu0 %v1354_v33  ;;  %v1176_v33 = vsel (!%p1173_p10), %vm783_vm1, 1.0, %v1578_v32 }
  0x81   : > { %716 = vmatmul.mubr.bf16.vlgmr.msra.gmra.mrb[0].mxu1 %v1357_v35 }
 0x153   : > { %v1209_v37 = vpop.f32.mrb[0].mxu0 }
 0x154   : > { %v1231_v38 = vpop.f32.mrb[0].mxu1  ;;  %v1210_v39 = vpop.f32.mrb[1].mxu0 }
 0x155   : > { %v1211_v40 = vadd.f32 %v1210_v39, %v1209_v37  ;;  %v1232_v41 = vpop.f32.mrb[1].mxu1  ;;  %v1212_v42 = vpop.f32.mrb[2].mxu0 }
 0x156   : > { %v1233_v43 = vadd.f32 %v1232_v41, %v1231_v38  ;;  %v1234_v44 = vpop.f32.mrb[2].mxu1  ;;  %v1213_v45 = vpop.f32.mrb[3].mxu0 }
 0x157   : > { %v1214_v47 = vadd.f32 %v1213_v45, %v1212_v42  ;;  %v1235_v48 = vpop.f32.mrb[3].mxu1 }
 0x158   : > { %v718_v49 = vadd.f32 %v1233_v43, %v1211_v40  ;;  %v1236_v50 = vadd.f32 %v1235_v48, %v1234_v44  ;;  %731 = sbr.rel (%p1173_p10) target bundleno = 1152 (0x480), region = 60 }
 0x15a   : > { %v724_v52 = vadd.f32 %v718_v49, %v360_v46  ;;  %v721_v53 = vadd.f32 %v1236_v50, %v1214_v47  ;;  %v938_v46 = vstv (!%p1173_p10), %s937_s23 }
 0x15c   : > { %726 = vst [vmem:[#allocation2] sm:$0xff] %v724_v52  ;;  %v725_v54 = vadd.f32 %v721_v53, %v361_v51 }
 0x15e   : > { %727 = vst [vmem:[#allocation2 + $0x8] sm:$0xff] %v725_v54 }
 0x15f   : > { %s811_s28 = scalar_select %p810_p3, 1, 0 }
 0x161   : > { %s812_s30 = scvt.s32.f32 %s811_s28 }
 0x163   : > { %v732_v55 = vld [vmem:[#allocation2] sm:$0xff]  ;;  %s882_s9 = ssub.f32 1.0, %s812_s30 }
 0x164   : > { %v741_v58 = vadd.f32 %v1174_v56, %v732_v55 }
 0x165   : > { %v733_v57 = vld [vmem:[#allocation2 + $0x8] sm:$0xff] }
 0x166   : > { %v742_v59 = vadd.f32 %v1174_v56, %v733_v57  ;;  %745 = vmax.xlane.f32.xlu0 %v741_v58  ;;  %743 = vst [vmem:[#allocation11] sm:$0xff] %v741_v58 }
 0x168   : > { %744 = vst [vmem:[#allocation11 + $0x8] sm:$0xff] %v742_v59 }
 0x16a   : > { %747 = vmax.xlane.f32.xlu0 %v742_v59 }
 0x16e   : > { %849 = vadd.xlane.f32.xlu0 %v848_v6 }
 0x1f3   : > { %v746_v60 = vpop.xlane.xlu0 %745 }
 0x1f4   : > { %v749_v61 = vsub.f32 %v741_v58, %v746_v60 }
 0x1f6   : > { %v751_v62 = vmul.f32 1.442695, %v749_v61 }
 0x1f7   : > { %v748_v63 = vpop.xlane.xlu0 %747 }
 0x1f8   : > { %v750_v0 = vsub.f32 %v742_v59, %v748_v63  ;;  %1360 = vpow2.f32 %v751_v62 }
 0x1fa   : > { %v753_v1 = vmul.f32 1.442695, %v750_v0 }
 0x1fb   : > { %v850_v31 = vpop.xlane.xlu0 %849 }
 0x1fc   : > { %1362 = vpow2.f32 %v753_v1  ;;  %vm853_vm3 = vcmp.eq.f32.partialorder %v850_v31, inf  ;;  %v856_v43 = vand.u32 2147483648, %v850_v31  ;;  %vm855_vm4 = vcmp.eq.f32.partialorder %v850_v31, 0.0 }
 0x202   : > { %v1361_v2 = vpop.eup %1360 }
 0x203   : > { %755 = vadd.xlane.f32.xlu1 %v1361_v2 }
 0x206   : > { %v1363_v3 = vpop.eup %1362 }
 0x207   : > { %757 = vadd.xlane.f32.xlu1 %v1363_v3 }
 0x290   : > { %v756_v7 = vpop.xlane.xlu1 %755 }
 0x291   : > { %1364 = vlog2.f32 %v756_v7 }
 0x294   : > { %v758_v8 = vpop.xlane.xlu1 %757 }
 0x295   : > { %1366 = vlog2.f32 %v758_v8 }
 0x29b   : > { %v1365_v9 = vpop.eup %1364 }
 0x29c   : > { %v760_v10 = vmul.f32 0.6931472, %v1365_v9 }
 0x29e   : > { %v763_v11 = vsub.f32 %v749_v61, %v760_v10 }
 0x29f   : > { %v1367_v12 = vpop.eup %1366 }
 0x2a0   : > { %v765_v13 = vmul.f32 1.442695, %v763_v11  ;;  %v762_v14 = vmul.f32 0.6931472, %v1367_v12 }
 0x2a2   : > { %1368 = vpow2.f32 %v765_v13  ;;  %v764_v16 = vsub.f32 %v750_v0, %v762_v14 }
 0x2a4   : > { %v767_v17 = vmul.f32 1.442695, %v764_v16 }
 0x2a6   : > { %1370 = vpow2.f32 %v767_v17 }
 0x2a7   : > { %1372 = vrsqrt.f32 %v850_v31 }
 0x2ac   : > { %v1828_v20 = vpop.eup %1368 }
 0x2ad   : > { %v826_v21 = vmul.f32 %v1828_v20, %v1828_v20  ;;  %v820_v24 = vmul.f32 %v1828_v20, %v818_v22  ;;  %v769_v26 = vmul.f32 %v1828_v20, %v763_v11  ;;  %v928_v36 = vmul.f32 %v1828_v20, %v1175_v34 }
 0x2af   : > { %828 = vadd.xlane.f32.xlu1 %v826_v21 }
 0x2b0   : > { %v1835_v23 = vpop.eup %1370 }
 0x2b1   : > { %v827_v25 = vmul.f32 %v1835_v23, %v1835_v23  ;;  %v821_v27 = vmul.f32 %v1835_v23, %v818_v22  ;;  %v770_v28 = vmul.f32 %v1835_v23, %v764_v16  ;;  %v929_v35 = vmul.f32 %v1835_v23, %v1176_v33  ;;  %v1373_v39 = vpop.eup %1372 }
 0x2b2   : > { %v852_v41 = vmul.f32 %v1373_v39, %v850_v31 }
 0x2b3   : > { %822 = vadd.xlane.f32.xlu1 %v820_v24  ;;  %830 = vadd.xlane.f32.xlu0 %v827_v25  ;;  %v930_v37 = vadd.f32 %v929_v35, %v928_v36  ;;  %v1871_v36 = vstv %s882_s9 }
 0x2b4   : > { %v854_v47 = vsel %vm853_vm3, %v850_v31, %v852_v41 }
 0x2b5   : > { %v931_v38 = vrot.slane %v930_v37, 4  ;;  %v857_v49 = vsel %vm855_vm4, %v856_v43, %v854_v47 }
 0x2b6   : > { %v860_v55 = vmax.f32 %v857_v49, 1e-08 }
 0x2b7   : > { %771 = vadd.xlane.f32.xlu1 %v769_v26  ;;  %824 = vadd.xlane.f32.xlu0 %v821_v27  ;;  %v932_v42 = vadd.f32 %v931_v38, %v930_v37 }
 0x2b8   : > { %v864_v1 = vrot.slane %v860_v55, %v817_v19 }
 0x2b9   : > { %v933_v48 = vrot.slane %v932_v42, 2 }
 0x2bb   : > { %773 = vadd.xlane.f32.xlu0 %v770_v28  ;;  %v934_v53 = vadd.f32 %v933_v48, %v932_v42 }
 0x2bd   : > { %v935_v61 = vrot.slane %v934_v53, 1 }
 0x2bf   : > { %v936_v9 = vadd.f32 %v935_v61, %v934_v53 }
 0x33c   : > { %v829_v40 = vpop.xlane.xlu1 %828 }
 0x33d   : > { %1374 = vrsqrt.f32 %v829_v40  ;;  %vm834_vm6 = vcmp.eq.f32.partialorder %v829_v40, inf  ;;  %v837_v59 = vand.u32 2147483648, %v829_v40  ;;  %vm836_vm7 = vcmp.eq.f32.partialorder %v829_v40, 0.0 }
 0x340   : > { %v1849_v44 = vpop.xlane.xlu1 %822  ;;  %v831_v45 = vpop.xlane.xlu0 %830 }
 0x341   : > { %1376 = vrsqrt.f32 %v831_v45  ;;  %vm841_vm10 = vcmp.eq.f32.partialorder %v831_v45, inf  ;;  %v844_v7 = vand.u32 2147483648, %v831_v45  ;;  %vm843_vm11 = vcmp.eq.f32.partialorder %v831_v45, 0.0 }
 0x342   : > { %1378 = vrcp.f32 %v938_v46 }
 0x344   : > { %v772_v50 = vpop.xlane.xlu1 %771  ;;  %v825_v51 = vpop.xlane.xlu0 %824 }
 0x345   : > { %v1851_v52 = vsub.f32 0.0, %v772_v50 }
 0x347   : > { %v1375_v54 = vpop.eup %1374  ;;  %vm788_vm5 = vcmp.lt.f32.partialorder %v1851_v52, 2.4538777  ;;  %v1181_v21 = vadd.f32 -2.4538777, %v1851_v52 }
 0x348   : > { %v833_v56 = vmul.f32 %v1375_v54, %v829_v40  ;;  %v774_v57 = vpop.xlane.xlu0 %773  ;;  %v1177_v58 = vsel %vm788_vm5, 1.0, %v1578_v32 }
 0x349   : > { %v1857_v60 = vsub.f32 0.0, %v774_v57  ;;  %v794_v2 = vmul.f32 %v1177_v58, %v1175_v34  ;;  %v902_v25 = vsub.f32 0.0, %v1181_v21 }
 0x34a   : > { %v835_v62 = vsel %vm834_vm6, %v829_v40, %v833_v56 }
 0x34b   : > { %v1377_v63 = vpop.eup %1376  ;;  %v838_v0 = vsel %vm836_vm7, %v837_v59, %v835_v62  ;;  %vm789_vm8 = vcmp.lt.f32.partialorder %v1857_v60, 2.4538777  ;;  %v797_v14 = vsel %vm796_vm9, %v794_v2, 0.0  ;;  %v1182_v24 = vadd.f32 -2.4538777, %v1857_v60 }
 0x34c   : > { %v858_v3 = vmax.f32 %v838_v0, 1e-08  ;;  %v840_v5 = vmul.f32 %v1377_v63, %v831_v45  ;;  %v1178_v6 = vsel %vm789_vm8, 1.0, %v1578_v32  ;;  %v1379_v10 = vpop.eup %1378  ;;  %v904_v29 = vmul.f32 1.442695, %v902_v25 }
 0x34d   : > { %v795_v8 = vmul.f32 %v1178_v6, %v1176_v33  ;;  %v940_v18 = vmul.f32 %v1379_v10, %v936_v9  ;;  %v903_v27 = vsub.f32 0.0, %v1182_v24  ;;  %v1869_v33 = vstv %s812_s30 }
 0x34e   : > { %v865_v11 = vmul.f32 %v864_v1, %v858_v3  ;;  %v842_v12 = vsel %vm841_vm10, %v831_v45, %v840_v5 }
 0x34f   : > { %v845_v13 = vsel %vm843_vm11, %v844_v7, %v842_v12  ;;  %v798_v15 = vsel %vm796_vm9, %v795_v8, 0.0  ;;  %v942_v22 = vmax.f32 %v940_v18, 1e-30  ;;  %v906_v34 = vmul.f32 1.442695, %v903_v27 }
 0x350   : > { %1380 = vrcp.f32 %v865_v11  ;;  %v859_v16 = vmax.f32 %v845_v13, 1e-08  ;;  %v799_v17 = vadd.f32 %v798_v15, %v797_v14  ;;  %vm941_vm14 = vcmp.gt.f32.partialorder %v940_v18, 0.0 }
 0x352   : > { %v866_v19 = vmul.f32 %v864_v1, %v859_v16  ;;  %800 = vadd.xlane.f32.xlu1 %v799_v17 }
 0x354   : > { %1382 = vrcp.f32 %v866_v19 }
 0x355   : > { %1384 = vlog2.f32 %v942_v22 }
 0x356   : > { %1386 = vpow2.f32 %v904_v29 }
 0x357   : > { %1388 = vpow2.f32 %v906_v34 }
 0x35a   : > { %v1381_v26 = vpop.eup %1380 }
 0x35b   : > { %v869_v28 = vmul.f32 %v1381_v26, %v1849_v44 }
 0x35d   : > { %v871_v30 = vand.u32 2147483647, %v869_v28 }
 0x35e   : > { %v1383_v31 = vpop.eup %1382 }
 0x35f   : > { %vm873_vm12 = vcmp.lt.f32.partialorder %v871_v30, 0.05  ;;  %v870_v35 = vmul.f32 %v1383_v31, %v825_v51  ;;  %v1385_v40 = vpop.eup %1384 }
 0x360   : > { %v1179_v37 = vsel %vm873_vm12, 1.0, %v1578_v32  ;;  %v944_v45 = vmul.f32 0.6931472, %v1385_v40  ;;  %v1387_v49 = vpop.eup %1386 }
 0x361   : > { %v880_v38 = vmul.f32 %v1179_v37, %v1869_v33  ;;  %v872_v39 = vand.u32 2147483647, %v870_v35  ;;  %v1389_v57 = vpop.eup %1388 }
 0x362   : > { %v945_v53 = vmul.f32 %v944_v45, %v940_v18 }
 0x363   : > { %v884_v41 = vadd.f32 %v1871_v36, %v880_v38  ;;  %vm874_vm13 = vcmp.lt.f32.partialorder %v872_v39, 0.05 }
 0x364   : > { %v1180_v42 = vsel %vm874_vm13, 1.0, %v1578_v32 }
 0x365   : > { %v881_v43 = vmul.f32 %v1180_v42, %v1869_v33  ;;  %v886_v44 = vmul.f32 %v884_v41, %v794_v2 }
 0x367   : > { %v885_v46 = vadd.f32 %v1871_v36, %v881_v43  ;;  %v908_v47 = vmul.f32 %v886_v44, %v1851_v52  ;;  %v960_v50 = vmul.f32 %v1828_v20, %v886_v44  ;;  %v888_v51 = vsel %vm796_vm9, %v886_v44, 0.0 }
 0x368   : > { %v946_v52 = vsel %vm941_vm14, %v945_v53, 0.0  ;;  %v976_v43 = vmul.f32 0.9, %v1820_v4 }
 0x369   : > { %v887_v48 = vmul.f32 %v885_v46, %v795_v8  ;;  %v910_v56 = vmul.f32 %v1387_v49, %v908_v47  ;;  %v947_v0 = vsel %vm847_vm0, %v946_v52, 0.0 }
 0x36b   : > { %v961_v54 = vmul.f32 %v1835_v23, %v887_v48  ;;  %v889_v55 = vsel %vm796_vm9, %v887_v48, 0.0  ;;  %v909_v32 = vmul.f32 %v887_v48, %v1857_v60  ;;  %v912_v62 = vsel %vm796_vm9, %v910_v56, 0.0 }
 0x36c   : > { %v890_v58 = vadd.f32 %v889_v55, %v888_v51 }
 0x36d   : > { %v962_v59 = vadd.f32 %v961_v54, %v960_v50  ;;  %v911_v61 = vmul.f32 %v1389_v57, %v909_v32 }
 0x36e   : > { %891 = vadd.xlane.f32.xlu0 %v890_v58 }
 0x36f   : > { %v913_v20 = vsel %vm796_vm9, %v911_v61, 0.0  ;;  %v963_v24 = vrot.slane %v962_v59, 4 }
 0x370   : > { %v914_v63 = vadd.f32 %v913_v20, %v912_v62 }
 0x371   : > { %v964_v26 = vadd.f32 %v963_v24, %v962_v59 }
 0x372   : > { %948 = vadd.xlane.f32.xlu0 %v947_v0  ;;  %915 = vadd.xlane.f32.xlu1 %v914_v63 }
 0x373   : > { %v965_v28 = vrot.slane %v964_v26, 2 }
 0x375   : > { %v966_v34 = vadd.f32 %v965_v28, %v964_v26 }
 0x377   : > { %v967_v37 = vrot.slane %v966_v34, 1 }
 0x379   : > { %v968_v40 = vadd.f32 %v967_v37, %v966_v34 }
 0x3df   : > { %v801_v23 = vpop.xlane.xlu1 %800 }
 0x3e0   : > { %v802_v1 = vrot.slane %v801_v23, 4 }
 0x3e2   : > { %v803_v60 = vadd.f32 %v802_v1, %v801_v23 }
 0x3e4   : > { %v804_v2 = vrot.slane %v803_v60, 2 }
 0x3e6   : > { %v805_v3 = vadd.f32 %v804_v2, %v803_v60 }
 0x3e8   : > { %v806_v5 = vrot.slane %v805_v3, 1 }
 0x3ea   : > { %v807_v6 = vadd.f32 %v806_v5, %v805_v3 }
 0x3ec   : > { %1237 = vpush %v807_v6 }
 0x3fb   : > { %v892_v7 = vpop.xlane.xlu0 %891 }
 0x3fc   : > { %v893_v8 = vrot.slane %v892_v7, 4 }
 0x3fe   : > { %v894_v9 = vadd.f32 %v893_v8, %v892_v7 }
 0x3ff   : > { %v916_v10 = vpop.xlane.xlu1 %915  ;;  %v949_v22 = vpop.xlane.xlu0 %948 }
 0x400   : > { %v895_v11 = vrot.slane %v894_v9, 2  ;;  %v917_v12 = vrot.slane %v916_v10, 4  ;;  %v950_v25 = vrot.slane %v949_v22, 4 }
 0x402   : > { %v918_v13 = vadd.f32 %v917_v12, %v916_v10  ;;  %v896_v14 = vadd.f32 %v895_v11, %v894_v9  ;;  %v951_v27 = vadd.f32 %v950_v25, %v949_v22 }
 0x404   : > { %v919_v15 = vrot.slane %v918_v13, 2  ;;  %v897_v16 = vrot.slane %v896_v14, 1  ;;  %v952_v29 = vrot.slane %v951_v27, 2 }
 0x406   : > { %v920_v17 = vadd.f32 %v919_v15, %v918_v13  ;;  %v898_v18 = vadd.f32 %v897_v16, %v896_v14  ;;  %v953_v35 = vadd.f32 %v952_v29, %v951_v27 }
 0x408   : > { %1239 = vpush %v898_v18  ;;  %v921_v19 = vrot.slane %v920_v17, 1  ;;  %v954_v38 = vrot.slane %v953_v35, 1 }
 0x40a   : > { %v922_v21 = vadd.f32 %v921_v19, %v920_v17  ;;  %v955_v41 = vadd.f32 %v954_v38, %v953_v35 }
 0x40c   : > { %1241 = vpush %v922_v21 }
 0x41d   : > { %s1238_s14 = spop %1237 }
 0x41e   : > { %994 = sst [smem:[#allocation14 + $0x2]] %s1238_s14 }
 0x439   : > { %s1240_s18 = spop %1239 }
 0x43a   : > { %v924_v30 = vstv %s1240_s18  ;;  %p969_p6 = scmp.gt.f32.partialorder %s1240_s18, 0.0  ;;  %s972_s12 = smax.f32 %s1579_s24, %s1240_s18 }
 0x43b   : > { %1390 = vrcp.f32 %v924_v30  ;;  %v973_v31 = vstv %s972_s12  ;;  %992 = sst [smem:[#allocation14 + $0x1]] %s1240_s18 }
 0x43c   : > { %1392 = vrcp.f32 %v973_v31  ;;  %s970_s26 = scalar_select %p969_p6, 1, 0 }
 0x43d   : > { %s1242_s25 = spop %1241 }
 0x43e   : > { %s971_s20 = scvt.s32.f32 %s970_s26 }
 0x440   : > { %s981_s21 = ssub.f32 1.0, %s971_s20  ;;  %v979_v48 = vstv %s971_s20 }
 0x442   : > { %v982_v46 = vstv %s981_s21 }
 0x443   : > { %v983_v50 = vmul.f32 %v982_v46, %v1820_v4 }
 0x445   : > { %v1391_v39 = vpop.eup %1390 }
 0x446   : > { %v1393_v42 = vpop.eup %1392  ;;  %1243 = vpush %v1391_v39 }
 0x447   : > { %v975_v44 = vmul.f32 %v1393_v42, %v968_v40  ;;  %1245 = vpush %v955_v41 }
 0x449   : > { %v977_v45 = vmul.f32 0.1, %v975_v44  ;;  %v986_v54 = vmul.f32 %v975_v44, %v1871_v36 }
 0x44b   : > { %v978_v47 = vadd.f32 %v977_v45, %v976_v43 }
 0x44d   : > { %v980_v49 = vmul.f32 %v979_v48, %v978_v47 }
 0x44f   : > { %v984_v51 = vadd.f32 %v983_v50, %v980_v49 }
 0x451   : > { %v985_v53 = vmul.f32 %v984_v51, %v1869_v33 }
 0x453   : > { %v987_v55 = vadd.f32 %v986_v54, %v985_v53 }
 0x455   : > { %988 = vst [vmem:[#allocation12] sm:$0x1] %v987_v55 }
 0x477   : > { %s1244_s17 = spop %1243 }
 0x478   : > { %s1246_s16 = spop %1245  ;;  %s927_s13 = smul.f32 %s1244_s17, %s1242_s25 }
 0x479   : > { %s957_s29 = ssub.f32 0.0, %s1246_s16 }
 0x47b   : > { %s958_s19 = smul.f32 0.5, %s957_s29  ;;  %996 = sst [smem:[#allocation14 + $0x3]] %s957_s29 }
 0x47d   : > { %s959_s22 = ssub.f32 %s927_s13, %s958_s19 }
 0x47f   : > { %990 = sst [smem:[#allocation14]] %s959_s22 }
 0x480 PF: > { %p1271_p0 = scmp.eq.s32.totalorder %s1655_s0, 1  ;;  %s1580_s23 = smov [#allocation11]  }
 0x481   : > { %s1003_s27 = sshll.u32 %s1580_s23, 4  ;;  %s1004_s27 = int_to_ptr.vmem [resolvable:$true] %s1003_s27 }
 0x482   : > { %s1454_s28 = scalar_lea.vmem %s1004_s27, 256  ;;  %p1461_p4 = scmp.lt.s32.totalorder %s1004_s27, %s1004_s27 }
 0x483   : > { %p1455_p1 = scmp.ne.s32.totalorder %s1004_s27, %s1454_s28  ;;  %p1462_p5 = scmp.lt.s32.totalorder %s1454_s28, %s1454_s28 }
 0x485   : > { %p1456_p12 = pnand %p1455_p1, %p1271_p0  ;;  %p1463_p9 = por %p1462_p5, %p1461_p4 }
 0x487   : > { %p1457_p2 = pneg %p1456_p12 }
 0x489   : > { %p1464_p11 = pnand %p1463_p9, %p1457_p2 }
 0x48b   : > { %1467 = shalt.err (!%p1464_p11)
}
 0x48c   : > { %s1468_s14 = scalar_lea.hbm %s1976_s6, 256 }
 0x48d   : > { %p1469_p13 = scmp.ne.s32.totalorder %s1976_s6, %s1468_s14  ;;  %p1474_p10 = scmp.lt.u32.totalorder %s1468_s14, %s1976_s6 }
 0x48f   : > { %p1470_p7 = pnand %p1469_p13, %p1271_p0 }
 0x491   : > { %p1471_p8 = pneg %p1470_p7 }
 0x493   : > { %p1476_p3 = pnand %p1474_p10, %p1471_p8 }
 0x495   : > { %1479 = shalt.err (!%p1476_p3)
}
 0x496   : > { %s1581_s20 = smov 128   ;;  %s1582_s21 = smov 8  }
 0x497   : > { %1252 = dma.vmem_to_hbm [thread:$0]  (%p1271_p0), %s1004_s27, 256, %s1976_s6, [#allocation7], %s1581_s20, %s1581_s20, %s1582_s21  }
 0x498   : > { %s1583_s16 = smov [#allocation12]  }
 0x499   : > { %s1017_s29 = sshll.u32 %s1583_s16, 4  ;;  %s1018_s29 = int_to_ptr.vmem [resolvable:$true] %s1017_s29 }
 0x49a   : > { %s1480_s13 = scalar_lea.vmem %s1018_s29, 16  ;;  %s1486_s19 = scalar_lea.vmem %s1018_s29, 32 }
 0x49b   : > { %p1481_p6 = scmp.ne.s32.totalorder %s1018_s29, %s1480_s13  ;;  %p1487_p2 = scmp.lt.s32.totalorder %s1018_s29, %s1018_s29 }
 0x49c   : > { %p1488_p4 = scmp.lt.s32.totalorder %s1486_s19, %s1480_s13 }
 0x49d   : > { %p1482_p1 = pnand %p1481_p6, %p1271_p0 }
 0x49e   : > { %p1489_p5 = por %p1488_p4, %p1487_p2 }
 0x49f   : > { %p1483_p12 = pneg %p1482_p1 }
 0x4a1   : > { %p1490_p9 = pnand %p1489_p5, %p1483_p12 }
 0x4a3   : > { %1493 = shalt.err (!%p1490_p9)
}
 0x4a4   : > { %s1494_s28 = scalar_lea.hbm %s1977_s7, 16 }
 0x4a5   : > { %p1495_p11 = scmp.ne.s32.totalorder %s1977_s7, %s1494_s28  ;;  %p1500_p8 = scmp.lt.u32.totalorder %s1494_s28, %s1977_s7 }
 0x4a7   : > { %p1496_p13 = pnand %p1495_p11, %p1271_p0 }
 0x4a9   : > { %p1497_p7 = pneg %p1496_p13 }
 0x4ab   : > { %p1502_p10 = pnand %p1500_p8, %p1497_p7 }
 0x4ad   : > { %1505 = shalt.err (!%p1502_p10)
}
 0x4ae   : > { %1254 = dma.vmem_to_hbm [thread:$0]  (%p1271_p0), %s1018_s29, 16, %s1977_s7, [#allocation13]  }
 0x4af   : > { %s1506_s20 = scalar_lea.hbm %s1978_s8, 16 }
 0x4b0   : > { %p1507_p3 = scmp.ne.s32.totalorder %s1978_s8, %s1506_s20  ;;  %p1512_p12 = scmp.lt.u32.totalorder %s1506_s20, %s1978_s8 }
 0x4b2   : > { %p1508_p6 = pnand %p1507_p3, %p1271_p0 }
 0x4b4   : > { %p1509_p1 = pneg %p1508_p6 }
 0x4b6   : > { %p1514_p2 = pnand %p1512_p12, %p1509_p1 }
 0x4b8   : > { %1517 = shalt.err (!%p1514_p2)
}
 0x4b9   : > { %s1584_s13 = smov [#allocation14]  }
 0x4ba   : > { %1256 = dma.smem_to_hbm (%p1271_p0), %s1584_s13, 16, %s1978_s8, [#allocation8]  }
 0x4bb   : > { %1543 = dma.done.wait (%p1271_p0), [#allocation7], 256  }
 0x4bc   : > { %1545 = vsyncadd (%p1271_p0), [#allocation7], 4294967040 }
 0x4bd   : > { %1547 = dma.done.wait (%p1271_p0), [#allocation13], 16  }
 0x4be   : > { %1549 = vsyncadd (%p1271_p0), [#allocation13], 4294967280 }
 0x4bf   : > { %1551 = dma.done.wait (%p1271_p0), [#allocation8], 16  }
 0x4c0   : > { %1553 = vsyncadd (%p1271_p0), [#allocation8], 4294967280 }
 0x4c1   : > { %1042 = sfence }
 0x4c2 PF: > { %p27_p4 = scmp.ge.s32.totalorder %s1658_s1, 4   ;;  %s1984_s9 = smov %s1560_s10 }
 0x4c3   : > { %s1985_s10 = smov %s1564_s11  ;;  %s1986_s11 = smov %s1668_s15 }
 0x4c4   : > { %s1987_s12 = smov %s1658_s1  ;;  %29 = sbr.rel (!%p27_p4) target bundleno = 11 (0xb), region = 123 }
 0x4cb   :  { %1048 = vsyncpa [#allocation6], 1 }
 0x4cc   :  { %1050 = vsyncpa [#allocation6 + $0x1], 1 }
 0x4cd   :  { %1051 = vsyncpa [#allocation10], 1 }
 0x4ce   :  { %1053 = vsyncpa [#allocation10 + $0x1], 1 }
 0x4cf   :  { %1054 = vsyncpa [#allocation7], 1 }
 0x4d0   :  { %1056 = vsyncpa [#allocation7 + $0x1], 1 }
 0x4d1   :  { %1057 = vsyncpa [#allocation13], 1 }
 0x4d2   :  { %1058 = vsyncpa [#allocation8], 1 }
 0x4d3   :  { %1060 = vsyncpa [#allocation8 + $0x1], 1 }

</bundles_post_ra>
